<compile_context>
chip_gen: v6e
topology: v6e:2x2x1
jax: 0.10.0
libtpu: 0.0.40
codegen_flags: <defaults>
</compile_context>

<pallas_src>
import jax
import jax.numpy as jnp
from jax.experimental import pallas as pl
from jax.experimental.pallas import tpu as pltpu


_LANE = 128      # vreg lane width: output last dim should be a multiple of this
_SUBLANE = 8     # vreg sublane width: batch tile must be a multiple of this


def _round_up(n, m):
    return ((n + m - 1) // m) * m


def _slp_kernel(x_ref, w_ref, b_ref, o_ref):
    # MXU matmul with f32 accumulation.
    z = jnp.dot(x_ref[...], w_ref[...], preferred_element_type=jnp.float32)
    z = z + b_ref[...]                       # bias broadcast (resident block)
    # sigmoid(z) = 1 / (1 + exp(-z)); approx reciprocal lowers to the EUP vrcp
    # slot and co-issues with the exp / MXU epilogue (frees VALU slots).
    o_ref[...] = pl.reciprocal(1.0 + jnp.exp(-z), approx=True).astype(o_ref.dtype)


def single_layer_perceptron(x, w, b, *, tb=256):
    """y = sigmoid(x @ w + b).

    x: (B, C_in) f32, w: (C_in, C_out) f32, b: (C_out,) f32 -> (B, C_out) f32.
    """
    B, C_in = x.shape
    C_out = w.shape[1]

    # ---- lane-dense / tile-aligned padding (wrapper-side, sliced off after) ----
    C_out_p = _round_up(C_out, _LANE)                               # lane-dense stores
    TB = min(_round_up(tb, _SUBLANE), _round_up(B, _SUBLANE))       # batch tile
    B_p = _round_up(B, TB)                                          # whole tiles only

    x_p = x if B_p == B else jnp.pad(x, ((0, B_p - B), (0, 0)))
    w_p = w if C_out_p == C_out else jnp.pad(w, ((0, 0), (0, C_out_p - C_out)))
    b_p = b if C_out_p == C_out else jnp.pad(b, (0, C_out_p - C_out))
    b2d = b_p.reshape(1, C_out_p)

    cost = pl.CostEstimate(
        flops=2 * B_p * C_in * C_out_p,
        transcendentals=B_p * C_out_p,
        bytes_accessed=4 * (B_p * C_in + C_in * C_out_p + C_out_p + B_p * C_out_p),
    )

    y_p = pl.pallas_call(
        _slp_kernel,
        out_shape=jax.ShapeDtypeStruct((B_p, C_out_p), jnp.float32),
        grid_spec=pltpu.PrefetchScalarGridSpec(
            num_scalar_prefetch=0,
            grid=(B_p // TB,),
            in_specs=[
                # activations: tiled over batch, auto double-buffered
                pl.BlockSpec((TB, C_in), lambda i: (i, 0)),
                # weights + bias: resident (same block index every step)
                pl.BlockSpec((C_in, C_out_p), lambda i: (0, 0)),
                pl.BlockSpec((1, C_out_p), lambda i: (0, 0)),
            ],
            out_specs=pl.BlockSpec((TB, C_out_p), lambda i: (i, 0)),
        ),
        compiler_params=pltpu.CompilerParams(
            # independent batch tiles -> shard across TensorCores on v7x
            dimension_semantics=("parallel",),
        ),
        cost_estimate=cost,
    )(x_p, w_p, b2d)

    return y_p[:B, :C_out]


if __name__ == "__main__":
    B, C_in, C_out = 8, 32, 16

    key = jax.random.PRNGKey(0)
    kx, kw, kb = jax.random.split(key, 3)

    x = jax.random.normal(kx, (B, C_in), dtype=jnp.float32)
    # Deterministic parameter init (PyTorch-style uniform bound 1/sqrt(fan_in)).
    bound = 1.0 / (C_in ** 0.5)
    w = jax.random.uniform(kw, (C_in, C_out), minval=-bound, maxval=bound,
                           dtype=jnp.float32)
    b = jax.random.uniform(kb, (C_out,), minval=-bound, maxval=bound,
                           dtype=jnp.float32)

    y = single_layer_perceptron(x, w, b)
    jax.block_until_ready(y)

    # Reference check against plain JAX (tolerance loosened slightly for the
    # EUP approximate reciprocal).
    y_ref = jax.nn.sigmoid(x @ w + b)
    assert y.shape == (B, C_out)
    assert jnp.allclose(y, y_ref, atol=2e-3, rtol=2e-3), \
        float(jnp.max(jnp.abs(y - y_ref)))

    print("KERNEL_OK")
</pallas_src>

<mosaic_0001>
module attributes {stable_mosaic.version = 11 : i64} {
  func.func @_slp_kernel(%arg0: i32, %arg1: memref<8x32xf32, #tpu.memory_space<vmem>>, %arg2: memref<32x128xf32, #tpu.memory_space<vmem>>, %arg3: memref<1x128xf32, #tpu.memory_space<vmem>>, %arg4: memref<8x128xf32, #tpu.memory_space<vmem>>) attributes {dimension_semantics = [#tpu.dimension_semantics<parallel>], iteration_bounds = array<i64: 1>, scalar_prefetch = 0 : i64, scratch_operands = 0 : i64, tpu.core_type = #tpu.core_type<tc>, window_params = [{transform_indices = @transform_0, window_bounds = array<i64: 8, 32>}, {pipeline_mode = #tpu.pipeline_mode<synchronous>, transform_indices = @transform_1, window_bounds = array<i64: 32, 128>}, {pipeline_mode = #tpu.pipeline_mode<synchronous>, transform_indices = @transform_2, window_bounds = array<i64: 1, 128>}, {transform_indices = @transform_3, window_bounds = array<i64: 8, 128>}]} {
    %c0 = arith.constant 0 : index
    %c0_0 = arith.constant 0 : index
    %0 = vector.load %arg1[%c0, %c0_0] : memref<8x32xf32, #tpu.memory_space<vmem>>, vector<8x32xf32>
    %c0_1 = arith.constant 0 : index
    %c0_2 = arith.constant 0 : index
    %1 = vector.load %arg2[%c0_1, %c0_2] : memref<32x128xf32, #tpu.memory_space<vmem>>, vector<32x128xf32>
    %cst = arith.constant dense<0.000000e+00> : vector<8x128xf32>
    %2 = tpu.matmul %0, %1, %cst {dimension_numbers = #tpu.dot_dimension_numbers<[1], [0], [0], [1], [0, 0, 1, 1], [], []>} : vector<8x32xf32>, vector<32x128xf32>, vector<8x128xf32> -> vector<8x128xf32>
    %c0_3 = arith.constant 0 : index
    %c0_4 = arith.constant 0 : index
    %3 = vector.load %arg3[%c0_3, %c0_4] : memref<1x128xf32, #tpu.memory_space<vmem>>, vector<1x128xf32>
    %4 = vector.broadcast %3 : vector<1x128xf32> to vector<8x128xf32>
    %5 = arith.addf %2, %4 : vector<8x128xf32>
    %cst_5 = arith.constant 0.000000e+00 : f32
    %6 = vector.broadcast %cst_5 : f32 to vector<8x128xf32>
    %7 = arith.subf %6, %5 : vector<8x128xf32>
    %8 = math.exp %7 : vector<8x128xf32>
    %cst_6 = arith.constant 1.000000e+00 : f32
    %9 = vector.broadcast %cst_6 : f32 to vector<8x128xf32>
    %10 = arith.addf %9, %8 : vector<8x128xf32>
    %11 = tpu.reciprocal %10 {approx = true} : vector<8x128xf32> -> vector<8x128xf32>
    %c0_7 = arith.constant 0 : index
    %c0_8 = arith.constant 0 : index
    %12 = vector.load %arg4[%c0_7, %c0_8] : memref<8x128xf32, #tpu.memory_space<vmem>>, vector<8x128xf32>
    tpu.vector_store %arg4[%c0_7, %c0_8], %11 {strides = array<i32>} : memref<8x128xf32, #tpu.memory_space<vmem>>, vector<8x128xf32>,
    return
  }
  func.func @transform_0(%arg0: i32) -> (i32, i32) {
    %c0_i32 = arith.constant 0 : i32
    %c0_i32_0 = arith.constant 0 : i32
    return %arg0, %c0_i32 : i32, i32
  }
  func.func @transform_1(%arg0: i32) -> (i32, i32) {
    %c0_i32 = arith.constant 0 : i32
    %c0_i32_0 = arith.constant 0 : i32
    %c0_i32_1 = arith.constant 0 : i32
    return %c0_i32, %c0_i32_0 : i32, i32
  }
  func.func @transform_2(%arg0: i32) -> (i32, i32) {
    %c0_i32 = arith.constant 0 : i32
    %c0_i32_0 = arith.constant 0 : i32
    %c0_i32_1 = arith.constant 0 : i32
    return %c0_i32, %c0_i32_0 : i32, i32
  }
  func.func @transform_3(%arg0: i32) -> (i32, i32) {
    %c0_i32 = arith.constant 0 : i32
    %c0_i32_0 = arith.constant 0 : i32
    return %arg0, %c0_i32 : i32, i32
  }
}

</mosaic_0001>

<bundles_post_ra>
// kernel: tpu_custom_call.1
= control target key start
LH: loop header
LB: loop body
LE: loop exit
PB: predicated region body
PF: predicated region fallthrough
CT: control target
= control target key end

     0   :  { %8 = vsyncpa [#allocation3], 0  ;;  %s283_s0 = inlined_call_operand.hbm [shape: f32[8,32], index: 0, kind: input, shape index: {}]   ;;  %s284_s1 = inlined_call_operand.hbm [shape: f32[32,128], index: 1, kind: input, shape index: {}]   ;;  %s285_s2 = inlined_call_operand.vmem [shape: f32[1,128], index: 2, kind: input, shape index: {}]   ;;  %s286_s3 = inlined_call_operand.hbm [shape: f32[8,128], index: 3, kind: output, shape index: {}]  }
   0x1   :  { %9 = vsyncpa [#allocation6], 0 }
   0x2   :  { %10 = vsyncpa [#allocation4], 0  ;;  %s244_s12 = smov [#allocation2]   ;;  %s245_s14 = smov [#allocation5]  }
   0x3   :  { %s17_s13 = sshll.u32 %s244_s12, 4  ;;  %s26_s15 = sshll.u32 %s245_s14, 4  ;;  %s18_s13 = int_to_ptr.vmem [resolvable:$true] %s17_s13  ;;  %s27_s15 = int_to_ptr.vmem [resolvable:$true] %s26_s15 }
   0x4   :  { %s186_s16 = scalar_lea.vmem %s18_s13, 128  ;;  %p191_p1 = scmp.lt.s32.totalorder %s18_s13, %s18_s13 }
   0x5   :  { %p187_p0 = scmp.ne.s32.totalorder %s18_s13, %s186_s16  ;;  %p192_p2 = scmp.lt.s32.totalorder %s186_s16, %s186_s16 }
   0x7   :  { %p193_p3 = por %p192_p2, %p191_p1 }
   0x9   :  { %p194_p4 = pnand %p193_p3, %p187_p0 }
   0xb   :  { %197 = shalt.err (!%p194_p4)
}
   0xc   :  { %20 = dma.hbm_to_vmem [thread:$0]  %s283_s0, 128, %s18_s13, [#allocation3]  }
   0xd   :  { %s206_s19 = scalar_lea.vmem %s27_s15, 512  ;;  %p211_p6 = scmp.lt.s32.totalorder %s27_s15, %s27_s15 }
   0xe   :  { %p207_p5 = scmp.ne.s32.totalorder %s27_s15, %s206_s19  ;;  %p212_p7 = scmp.lt.s32.totalorder %s206_s19, %s206_s19 }
  0x10   :  { %p213_p8 = por %p212_p7, %p211_p6 }
  0x12   :  { %p214_p9 = pnand %p213_p8, %p207_p5 }
  0x14   :  { %217 = shalt.err (!%p214_p9)
}
  0x15   :  { %s246_s20 = smov 128   ;;  %s247_s21 = smov 8  }
  0x16   :  { %32 = dma.hbm_to_vmem [thread:$0]  %s284_s1, 512, %s27_s15, [#allocation6], %s246_s20, %s246_s20, %s247_s21  }
  0x17   :  { %238 = dma.done.wait [#allocation3], 128  }
  0x18   :  { %239 = vsyncadd [#allocation3], 4294967168 }
  0x19   :  { %240 = dma.done.wait [#allocation6], 512  }
  0x1a   :  { %241 = vsyncadd [#allocation6], 4294966784  ;;  %v248_v0 = vmov 0.0   ;;  %vm249_vm0 = vmmov 0   ;;  %v45_v1 = vld [vmem:[#allocation5 + $0x18] sm:$0xff]  ;;  %v44_v2 = vld [vmem:[#allocation5 + $0x10] sm:$0xff] }
  0x1b   :  { %156 = vmatprep.subr.mxu0 %v248_v0  ;;  %164 = vmatprep.mubr.msk.f32.mxu0 %vm249_vm0, %v248_v0  ;;  %v43_v3 = vld [vmem:[#allocation5 + $0x8] sm:$0xff]  ;;  %v42_v4 = vld [vmem:[#allocation5] sm:$0xff]  ;;  %v41_v5 = vld [vmem:[#allocation2] sm:$0xff]  ;;  %vm53_vm1 = vcmask 261120   ;;  %s250_s24 = smov [#allocation7]  }
  0x1c   :  { %157 = vmatpush3.msra.mxu0 %v45_v1  ;;  %v149_v6 = vld [vmem:[%s285_s2] ss:$0 sm:$0xff]  ;;  %s139_s25 = sshll.u32 %s250_s24, 4  ;;  %s140_s25 = int_to_ptr.vmem [resolvable:$true] %s139_s25 }
  0x1d   :  { %158 = vmatprep.subr.mxu0 %v248_v0  ;;  %s218_s26 = scalar_lea.vmem %s140_s25, 128  ;;  %p223_p11 = scmp.lt.s32.totalorder %s140_s25, %s140_s25 }
  0x1e   :  { %159 = vmatpush3.msra.mxu0 %v44_v2  ;;  %p219_p10 = scmp.ne.s32.totalorder %s140_s25, %s218_s26  ;;  %p224_p12 = scmp.lt.s32.totalorder %s218_s26, %s218_s26 }
  0x1f   :  { %160 = vmatprep.subr.mxu0 %v248_v0 }
  0x20   :  { %161 = vmatpush3.msra.mxu0 %v43_v3  ;;  %p225_p13 = por %p224_p12, %p223_p11 }
  0x21   :  { %162 = vmatprep.subr.mxu0 %v248_v0 }
  0x22   :  { %163 = vmatpush3.msra.mxu0 %v42_v4  ;;  %p226_p0 = pnand %p225_p13, %p219_p10 }
  0x23   :  { %165 = vmatmul.mubr.msk.f32.vlgmr.msra.gmra.mxu0 %vm53_vm1, %v41_v5 }
  0xe3   :  { %v123_v7 = vpop.f32.mrf.mxu0 }
  0xe4   :  { %v124_v8 = vadd.f32 %v149_v6, %v123_v7 }
  0xe5   :  { %v166_v9 = vpop.f32.mrf.mxu0 }
  0xe6   :  { %v127_v10 = vsub.f32 0.0, %v124_v8 }
  0xe8   :  { %v128_v11 = vmul.f32 1.442695, %v127_v10 }
  0xea   :  { %174 = vpow2.f32 %v128_v11 }
  0xf7   :  { %v175_v12 = vpop.eup %174 }
  0xf8   :  { %v130_v13 = vadd.f32 1.0, %v175_v12 }
  0xfa   :  { %176 = vrcp.f32 %v130_v13 }
 0x107   :  { %v177_v14 = vpop.eup %176 }
 0x108   :  { %132 = vst [vmem:[#allocation7] sm:$0xff] %v177_v14 }
 0x109   :  { %229 = shalt.err (!%p226_p0)
}
 0x10a   :  { %142 = dma.vmem_to_hbm [thread:$0]  %s140_s25, 128, %s286_s3, [#allocation4]  }
 0x10b   :  { %242 = dma.done.wait [#allocation4], 128  }
 0x10c   :  { %243 = vsyncadd [#allocation4], 4294967168 }
 0x10d   :  { %146 = vsyncpa [#allocation3], 1 }
 0x10e   :  { %147 = vsyncpa [#allocation6], 1 }
 0x10f   :  { %148 = vsyncpa [#allocation4], 1 }

</bundles_post_ra>
